<compile_context>
chip_gen: v7x
topology: tpu7x:2x2x1
jax: 0.10.0
libtpu: 0.0.40
codegen_flags: <defaults>
</compile_context>

<pallas_src>
import math

import jax
import jax.numpy as jnp
from jax import lax
from jax.experimental import pallas as pl
from jax.experimental.pallas import tpu as pltpu

D_MODEL = 64
N_HEAD = 8
SEQ_LEN = 16
BATCH = 2
HEAD_DIM = D_MODEL // N_HEAD


def _attn_kernel(x_ref, wqkv_ref, bqkv_ref, wo_ref, bo_ref, mask_ref, o_ref):
    # One grid step per batch element: x_ref is the (S, D) activation slab (bf16).
    x = x_ref[...]                                   # (S, D) bf16

    # Fused QKV projection: bf16 MXU operands, f32 accumulate, f32 bias add.
    # The 1/sqrt(head_dim) scale is already folded into the Q weight/bias columns.
    qkv = jnp.dot(x, wqkv_ref[...], preferred_element_type=jnp.float32) + bqkv_ref[...]
    q = qkv[:, 0 * D_MODEL:1 * D_MODEL]              # (S, D) f32, pre-scaled
    k = qkv[:, 1 * D_MODEL:2 * D_MODEL]
    v = qkv[:, 2 * D_MODEL:3 * D_MODEL]

    # Stack heads along rows (head-major): row i = h*S + s, shape (R, hd).
    def stack_heads(t):
        return jnp.concatenate(
            [t[:, h * HEAD_DIM:(h + 1) * HEAD_DIM] for h in range(N_HEAD)], axis=0)

    qh = stack_heads(q).astype(jnp.bfloat16)         # (R, hd) bf16 for the MXU
    kh = stack_heads(k).astype(jnp.bfloat16)
    vh = stack_heads(v)                              # f32; cast at the att@v matmul

    # One block-diagonal score matmul: contract last dims of both operands (no k.T).
    scores = lax.dot_general(qh, kh, (((1,), (1,)), ((), ())),
                             preferred_element_type=jnp.float32)   # (R, R) f32

    # Precomputed additive block-causal mask (0 where allowed, -1e30 where masked).
    scores = scores + mask_ref[...]

    # Numerically stable softmax in f32; normalization deferred to after att@v.
    scores = scores - jnp.max(scores, axis=-1, keepdims=True)
    p = jnp.exp(scores)                              # masked entries underflow to 0
    denom = jnp.sum(p, axis=-1, keepdims=True)       # (R, 1) f32
    yh = jnp.dot(p.astype(jnp.bfloat16), vh.astype(jnp.bfloat16),
                 preferred_element_type=jnp.float32)                 # (R, hd) f32
    yh = yh / denom                                  # exact divide on tiny (R, 1)

    # Un-stack heads back to (S, D) with a single lane concatenate.
    y = jnp.concatenate(
        [yh[h * SEQ_LEN:(h + 1) * SEQ_LEN, :] for h in range(N_HEAD)], axis=-1)

    # Output projection (bf16 operands, f32 acc); residual dropout = identity (eval).
    out = jnp.dot(y.astype(jnp.bfloat16), wo_ref[...],
                  preferred_element_type=jnp.float32) + bo_ref[...]
    o_ref[...] = out.astype(o_ref.dtype)


def causal_self_attention(x, params):
    """x: (B, S, D) f32; params: PyTorch-style (W:(out,in), b:(1,out)) for q, k, v, o."""
    wq, bq, wk, bk, wv, bv, wo, bo = params
    B, S, D = x.shape
    R = N_HEAD * S

    # One-time layout plumbing OUTSIDE the kernel:
    #  - transpose weights to (in, out), fuse QKV, fold softmax scale into Q,
    #  - cast matmul operands to bf16 (biases stay f32),
    #  - build the additive block-causal mask (same head AND causal within head).
    scale = 1.0 / math.sqrt(HEAD_DIM)
    wqkv = jnp.concatenate([wq.T * scale, wk.T, wv.T], axis=1).astype(jnp.bfloat16)  # (D, 3D)
    bqkv = jnp.concatenate([bq * scale, bk, bv], axis=1).astype(jnp.float32)         # (1, 3D)
    wo_t = wo.T.astype(jnp.bfloat16)                                                 # (D, D)
    bo_f = bo.astype(jnp.float32)                                                    # (1, D)

    ri = jnp.arange(R)[:, None]
    ci = jnp.arange(R)[None, :]
    allowed = (ri // S == ci // S) & (ri % S >= ci % S)
    mask_bias = jnp.where(allowed, 0.0, -1e30).astype(jnp.float32)                   # (R, R)

    x2 = x.reshape(B * S, D).astype(jnp.bfloat16)

    out = pl.pallas_call(
        _attn_kernel,
        out_shape=jax.ShapeDtypeStruct((B * S, D), jnp.float32),
        grid_spec=pltpu.PrefetchScalarGridSpec(
            num_scalar_prefetch=0,
            grid=(B,),                                      # one step per batch elem
            in_specs=[
                pl.BlockSpec((S, D), lambda b: (b, 0)),       # x rows of this batch
                pl.BlockSpec((D, 3 * D), lambda b: (0, 0)),   # fused Wqkv (in, out) bf16
                pl.BlockSpec((1, 3 * D), lambda b: (0, 0)),   # fused bias f32
                pl.BlockSpec((D, D), lambda b: (0, 0)),       # Wo (in, out) bf16
                pl.BlockSpec((1, D), lambda b: (0, 0)),       # bo f32
                pl.BlockSpec((R, R), lambda b: (0, 0)),       # additive causal mask
            ],
            out_specs=pl.BlockSpec((S, D), lambda b: (b, 0)),
        ),
        compiler_params=pltpu.CompilerParams(
            dimension_semantics=("parallel",)),             # both v7x TCs get work
    )(x2, wqkv, bqkv, wo_t, bo_f, mask_bias)

    return out.reshape(B, S, D)


def init_params(key, d_model=D_MODEL):
    # PyTorch nn.Linear default init: U(-1/sqrt(in), +1/sqrt(in)), weight is (out, in).
    bound = 1.0 / math.sqrt(d_model)
    keys = jax.random.split(key, 8)

    def w(k):
        return jax.random.uniform(k, (d_model, d_model), jnp.float32, -bound, bound)

    def b(k):
        return jax.random.uniform(k, (1, d_model), jnp.float32, -bound, bound)

    return (w(keys[0]), b(keys[1]),   # q
            w(keys[2]), b(keys[3]),   # k
            w(keys[4]), b(keys[5]),   # v
            w(keys[6]), b(keys[7]))   # o


def reference(x, params):
    wq, bq, wk, bk, wv, bv, wo, bo = params
    B, S, D = x.shape
    hd = D // N_HEAD
    q = (x @ wq.T + bq[0]).reshape(B, S, N_HEAD, hd).transpose(0, 2, 1, 3)
    k = (x @ wk.T + bk[0]).reshape(B, S, N_HEAD, hd).transpose(0, 2, 1, 3)
    v = (x @ wv.T + bv[0]).reshape(B, S, N_HEAD, hd).transpose(0, 2, 1, 3)
    att = jnp.einsum('bhqd,bhkd->bhqk', q, k) / math.sqrt(hd)
    mask = jnp.tril(jnp.ones((S, S), dtype=bool))
    att = jnp.where(mask[None, None], att, -jnp.inf)
    att = jax.nn.softmax(att, axis=-1)
    y = jnp.einsum('bhqk,bhkd->bhqd', att, v)
    y = y.transpose(0, 2, 1, 3).reshape(B, S, D)
    return y @ wo.T + bo[0]


if __name__ == "__main__":
    key = jax.random.PRNGKey(0)
    kx, kp = jax.random.split(key)
    x = jax.random.normal(kx, (BATCH, SEQ_LEN, D_MODEL), dtype=jnp.float32)
    params = init_params(kp)

    y = causal_self_attention(x, params)
    y = jax.block_until_ready(y)

    y_ref = reference(x, params)
    # bf16 MXU operands (per perf review) vs. the f32 reference: ~1e-3 typical
    # relative error; 1e-2 tolerance leaves margin for worst-case elements.
    assert jnp.allclose(y, y_ref, atol=1e-2, rtol=1e-2), "mismatch vs JAX reference"
    print("KERNEL_OK")
</pallas_src>

<mosaic_0001>
module attributes {stable_mosaic.version = 11 : i64} {
  func.func @_attn_kernel(%arg0: i32, %arg1: memref<16x64xbf16, #tpu.memory_space<vmem>>, %arg2: memref<64x192xbf16, #tpu.memory_space<vmem>>, %arg3: memref<1x192xf32, #tpu.memory_space<vmem>>, %arg4: memref<64x64xbf16, #tpu.memory_space<vmem>>, %arg5: memref<1x64xf32, #tpu.memory_space<vmem>>, %arg6: memref<128x128xf32, #tpu.memory_space<vmem>>, %arg7: memref<16x64xf32, #tpu.memory_space<vmem>>) attributes {dimension_semantics = [#tpu.dimension_semantics<parallel>], iteration_bounds = array<i64: 2>, scalar_prefetch = 0 : i64, scratch_operands = 0 : i64, tpu.core_type = #tpu.core_type<tc>, window_params = [{transform_indices = @transform_0, window_bounds = array<i64: 16, 64>}, {pipeline_mode = #tpu.pipeline_mode<synchronous>, transform_indices = @transform_1, window_bounds = array<i64: 64, 192>}, {pipeline_mode = #tpu.pipeline_mode<synchronous>, transform_indices = @transform_2, window_bounds = array<i64: 1, 192>}, {pipeline_mode = #tpu.pipeline_mode<synchronous>, transform_indices = @transform_3, window_bounds = array<i64: 64, 64>}, {pipeline_mode = #tpu.pipeline_mode<synchronous>, transform_indices = @transform_4, window_bounds = array<i64: 1, 64>}, {pipeline_mode = #tpu.pipeline_mode<synchronous>, transform_indices = @transform_5, window_bounds = array<i64: 128, 128>}, {transform_indices = @transform_6, window_bounds = array<i64: 16, 64>}]} {
    %c0 = arith.constant 0 : index
    %c0_0 = arith.constant 0 : index
    %0 = vector.load %arg1[%c0, %c0_0] : memref<16x64xbf16, #tpu.memory_space<vmem>>, vector<16x64xbf16>
    %c0_1 = arith.constant 0 : index
    %c0_2 = arith.constant 0 : index
    %1 = vector.load %arg2[%c0_1, %c0_2] : memref<64x192xbf16, #tpu.memory_space<vmem>>, vector<64x192xbf16>
    %cst = arith.constant dense<0.000000e+00> : vector<16x192xf32>
    %2 = tpu.matmul %0, %1, %cst {dimension_numbers = #tpu.dot_dimension_numbers<[1], [0], [0], [1], [0, 0, 1, 1], [], []>} : vector<16x64xbf16>, vector<64x192xbf16>, vector<16x192xf32> -> vector<16x192xf32>
    %c0_3 = arith.constant 0 : index
    %c0_4 = arith.constant 0 : index
    %3 = vector.load %arg3[%c0_3, %c0_4] : memref<1x192xf32, #tpu.memory_space<vmem>>, vector<1x192xf32>
    %4 = vector.broadcast %3 : vector<1x192xf32> to vector<16x192xf32>
    %5 = arith.addf %2, %4 : vector<16x192xf32>
    %6 = vector.extract_strided_slice %5 {offsets = [0, 0], sizes = [16, 64], strides = [1, 1]} : vector<16x192xf32> to vector<16x64xf32>
    %7 = vector.extract_strided_slice %5 {offsets = [0, 64], sizes = [16, 64], strides = [1, 1]} : vector<16x192xf32> to vector<16x64xf32>
    %8 = vector.extract_strided_slice %5 {offsets = [0, 128], sizes = [16, 64], strides = [1, 1]} : vector<16x192xf32> to vector<16x64xf32>
    %9 = vector.extract_strided_slice %6 {offsets = [0, 0], sizes = [16, 8], strides = [1, 1]} : vector<16x64xf32> to vector<16x8xf32>
    %10 = vector.extract_strided_slice %6 {offsets = [0, 8], sizes = [16, 8], strides = [1, 1]} : vector<16x64xf32> to vector<16x8xf32>
    %11 = vector.extract_strided_slice %6 {offsets = [0, 16], sizes = [16, 8], strides = [1, 1]} : vector<16x64xf32> to vector<16x8xf32>
    %12 = vector.extract_strided_slice %6 {offsets = [0, 24], sizes = [16, 8], strides = [1, 1]} : vector<16x64xf32> to vector<16x8xf32>
    %13 = vector.extract_strided_slice %6 {offsets = [0, 32], sizes = [16, 8], strides = [1, 1]} : vector<16x64xf32> to vector<16x8xf32>
    %14 = vector.extract_strided_slice %6 {offsets = [0, 40], sizes = [16, 8], strides = [1, 1]} : vector<16x64xf32> to vector<16x8xf32>
    %15 = vector.extract_strided_slice %6 {offsets = [0, 48], sizes = [16, 8], strides = [1, 1]} : vector<16x64xf32> to vector<16x8xf32>
    %16 = vector.extract_strided_slice %6 {offsets = [0, 56], sizes = [16, 8], strides = [1, 1]} : vector<16x64xf32> to vector<16x8xf32>
    %17 = tpu.concatenate %9, %10, %11, %12, %13, %14, %15, %16 in 0 : vector<16x8xf32>, vector<16x8xf32>, vector<16x8xf32>, vector<16x8xf32>, vector<16x8xf32>, vector<16x8xf32>, vector<16x8xf32>, vector<16x8xf32> -> vector<128x8xf32>
    %18 = arith.truncf %17 : vector<128x8xf32> to vector<128x8xbf16>
    %19 = vector.extract_strided_slice %7 {offsets = [0, 0], sizes = [16, 8], strides = [1, 1]} : vector<16x64xf32> to vector<16x8xf32>
    %20 = vector.extract_strided_slice %7 {offsets = [0, 8], sizes = [16, 8], strides = [1, 1]} : vector<16x64xf32> to vector<16x8xf32>
    %21 = vector.extract_strided_slice %7 {offsets = [0, 16], sizes = [16, 8], strides = [1, 1]} : vector<16x64xf32> to vector<16x8xf32>
    %22 = vector.extract_strided_slice %7 {offsets = [0, 24], sizes = [16, 8], strides = [1, 1]} : vector<16x64xf32> to vector<16x8xf32>
    %23 = vector.extract_strided_slice %7 {offsets = [0, 32], sizes = [16, 8], strides = [1, 1]} : vector<16x64xf32> to vector<16x8xf32>
    %24 = vector.extract_strided_slice %7 {offsets = [0, 40], sizes = [16, 8], strides = [1, 1]} : vector<16x64xf32> to vector<16x8xf32>
    %25 = vector.extract_strided_slice %7 {offsets = [0, 48], sizes = [16, 8], strides = [1, 1]} : vector<16x64xf32> to vector<16x8xf32>
    %26 = vector.extract_strided_slice %7 {offsets = [0, 56], sizes = [16, 8], strides = [1, 1]} : vector<16x64xf32> to vector<16x8xf32>
    %27 = tpu.concatenate %19, %20, %21, %22, %23, %24, %25, %26 in 0 : vector<16x8xf32>, vector<16x8xf32>, vector<16x8xf32>, vector<16x8xf32>, vector<16x8xf32>, vector<16x8xf32>, vector<16x8xf32>, vector<16x8xf32> -> vector<128x8xf32>
    %28 = arith.truncf %27 : vector<128x8xf32> to vector<128x8xbf16>
    %29 = vector.extract_strided_slice %8 {offsets = [0, 0], sizes = [16, 8], strides = [1, 1]} : vector<16x64xf32> to vector<16x8xf32>
    %30 = vector.extract_strided_slice %8 {offsets = [0, 8], sizes = [16, 8], strides = [1, 1]} : vector<16x64xf32> to vector<16x8xf32>
    %31 = vector.extract_strided_slice %8 {offsets = [0, 16], sizes = [16, 8], strides = [1, 1]} : vector<16x64xf32> to vector<16x8xf32>
    %32 = vector.extract_strided_slice %8 {offsets = [0, 24], sizes = [16, 8], strides = [1, 1]} : vector<16x64xf32> to vector<16x8xf32>
    %33 = vector.extract_strided_slice %8 {offsets = [0, 32], sizes = [16, 8], strides = [1, 1]} : vector<16x64xf32> to vector<16x8xf32>
    %34 = vector.extract_strided_slice %8 {offsets = [0, 40], sizes = [16, 8], strides = [1, 1]} : vector<16x64xf32> to vector<16x8xf32>
    %35 = vector.extract_strided_slice %8 {offsets = [0, 48], sizes = [16, 8], strides = [1, 1]} : vector<16x64xf32> to vector<16x8xf32>
    %36 = vector.extract_strided_slice %8 {offsets = [0, 56], sizes = [16, 8], strides = [1, 1]} : vector<16x64xf32> to vector<16x8xf32>
    %37 = tpu.concatenate %29, %30, %31, %32, %33, %34, %35, %36 in 0 : vector<16x8xf32>, vector<16x8xf32>, vector<16x8xf32>, vector<16x8xf32>, vector<16x8xf32>, vector<16x8xf32>, vector<16x8xf32>, vector<16x8xf32> -> vector<128x8xf32>
    %cst_5 = arith.constant dense<0.000000e+00> : vector<128x128xf32>
    %38 = tpu.matmul %18, %28, %cst_5 {dimension_numbers = #tpu.dot_dimension_numbers<[1], [1], [0], [0], [0, 0, 1, 0], [], []>} : vector<128x8xbf16>, vector<128x8xbf16>, vector<128x128xf32> -> vector<128x128xf32>
    %c0_6 = arith.constant 0 : index
    %c0_7 = arith.constant 0 : index
    %39 = vector.load %arg6[%c0_6, %c0_7] : memref<128x128xf32, #tpu.memory_space<vmem>>, vector<128x128xf32>
    %40 = arith.addf %38, %39 : vector<128x128xf32>
    %cst_8 = arith.constant dense<0xFF800000> : vector<128xf32>
    %41 = vector.multi_reduction <maximumf>, %40, %cst_8 [1] : vector<128x128xf32> to vector<128xf32>
    %42 = vector.shape_cast %41 : vector<128xf32> to vector<128x1xf32>
    %43 = vector.broadcast %42 : vector<128x1xf32> to vector<128x128xf32>
    %44 = arith.subf %40, %43 : vector<128x128xf32>
    %45 = math.exp %44 : vector<128x128xf32>
    %cst_9 = arith.constant dense<0.000000e+00> : vector<128xf32>
    %46 = vector.multi_reduction <add>, %45, %cst_9 [1] : vector<128x128xf32> to vector<128xf32>
    %47 = vector.shape_cast %46 : vector<128xf32> to vector<128x1xf32>
    %48 = arith.truncf %45 : vector<128x128xf32> to vector<128x128xbf16>
    %49 = arith.truncf %37 : vector<128x8xf32> to vector<128x8xbf16>
    %cst_10 = arith.constant dense<0.000000e+00> : vector<128x8xf32>
    %50 = tpu.matmul %48, %49, %cst_10 {dimension_numbers = #tpu.dot_dimension_numbers<[1], [0], [0], [1], [0, 0, 1, 1], [], []>} : vector<128x128xbf16>, vector<128x8xbf16>, vector<128x8xf32> -> vector<128x8xf32>
    %51 = vector.broadcast %47 : vector<128x1xf32> to vector<128x8xf32>
    %52 = arith.divf %50, %51 : vector<128x8xf32>
    %53 = vector.extract_strided_slice %52 {offsets = [0, 0], sizes = [16, 8], strides = [1, 1]} : vector<128x8xf32> to vector<16x8xf32>
    %54 = vector.extract_strided_slice %52 {offsets = [16, 0], sizes = [16, 8], strides = [1, 1]} : vector<128x8xf32> to vector<16x8xf32>
    %55 = vector.extract_strided_slice %52 {offsets = [32, 0], sizes = [16, 8], strides = [1, 1]} : vector<128x8xf32> to vector<16x8xf32>
    %56 = vector.extract_strided_slice %52 {offsets = [48, 0], sizes = [16, 8], strides = [1, 1]} : vector<128x8xf32> to vector<16x8xf32>
    %57 = vector.extract_strided_slice %52 {offsets = [64, 0], sizes = [16, 8], strides = [1, 1]} : vector<128x8xf32> to vector<16x8xf32>
    %58 = vector.extract_strided_slice %52 {offsets = [80, 0], sizes = [16, 8], strides = [1, 1]} : vector<128x8xf32> to vector<16x8xf32>
    %59 = vector.extract_strided_slice %52 {offsets = [96, 0], sizes = [16, 8], strides = [1, 1]} : vector<128x8xf32> to vector<16x8xf32>
    %60 = vector.extract_strided_slice %52 {offsets = [112, 0], sizes = [16, 8], strides = [1, 1]} : vector<128x8xf32> to vector<16x8xf32>
    %61 = tpu.concatenate %53, %54, %55, %56, %57, %58, %59, %60 in 1 : vector<16x8xf32>, vector<16x8xf32>, vector<16x8xf32>, vector<16x8xf32>, vector<16x8xf32>, vector<16x8xf32>, vector<16x8xf32>, vector<16x8xf32> -> vector<16x64xf32>
    %62 = arith.truncf %61 : vector<16x64xf32> to vector<16x64xbf16>
    %c0_11 = arith.constant 0 : index
    %c0_12 = arith.constant 0 : index
    %63 = vector.load %arg4[%c0_11, %c0_12] : memref<64x64xbf16, #tpu.memory_space<vmem>>, vector<64x64xbf16>
    %cst_13 = arith.constant dense<0.000000e+00> : vector<16x64xf32>
    %64 = tpu.matmul %62, %63, %cst_13 {dimension_numbers = #tpu.dot_dimension_numbers<[1], [0], [0], [1], [0, 0, 1, 1], [], []>} : vector<16x64xbf16>, vector<64x64xbf16>, vector<16x64xf32> -> vector<16x64xf32>
    %c0_14 = arith.constant 0 : index
    %c0_15 = arith.constant 0 : index
    %65 = vector.load %arg5[%c0_14, %c0_15] : memref<1x64xf32, #tpu.memory_space<vmem>>, vector<1x64xf32>
    %66 = vector.broadcast %65 : vector<1x64xf32> to vector<16x64xf32>
    %67 = arith.addf %64, %66 : vector<16x64xf32>
    %c0_16 = arith.constant 0 : index
    %c0_17 = arith.constant 0 : index
    %68 = vector.load %arg7[%c0_16, %c0_17] : memref<16x64xf32, #tpu.memory_space<vmem>>, vector<16x64xf32>
    tpu.vector_store %arg7[%c0_16, %c0_17], %67 {strides = array<i32>} : memref<16x64xf32, #tpu.memory_space<vmem>>, vector<16x64xf32>,
    return
  }
  func.func @transform_0(%arg0: i32) -> (i32, i32) {
    %c0_i32 = arith.constant 0 : i32
    %c0_i32_0 = arith.constant 0 : i32
    return %arg0, %c0_i32 : i32, i32
  }
  func.func @transform_1(%arg0: i32) -> (i32, i32) {
    %c0_i32 = arith.constant 0 : i32
    %c0_i32_0 = arith.constant 0 : i32
    %c0_i32_1 = arith.constant 0 : i32
    return %c0_i32, %c0_i32_0 : i32, i32
  }
  func.func @transform_2(%arg0: i32) -> (i32, i32) {
    %c0_i32 = arith.constant 0 : i32
    %c0_i32_0 = arith.constant 0 : i32
    %c0_i32_1 = arith.constant 0 : i32
    return %c0_i32, %c0_i32_0 : i32, i32
  }
  func.func @transform_3(%arg0: i32) -> (i32, i32) {
    %c0_i32 = arith.constant 0 : i32
    %c0_i32_0 = arith.constant 0 : i32
    %c0_i32_1 = arith.constant 0 : i32
    return %c0_i32, %c0_i32_0 : i32, i32
  }
  func.func @transform_4(%arg0: i32) -> (i32, i32) {
    %c0_i32 = arith.constant 0 : i32
    %c0_i32_0 = arith.constant 0 : i32
    %c0_i32_1 = arith.constant 0 : i32
    return %c0_i32, %c0_i32_0 : i32, i32
  }
  func.func @transform_5(%arg0: i32) -> (i32, i32) {
    %c0_i32 = arith.constant 0 : i32
    %c0_i32_0 = arith.constant 0 : i32
    %c0_i32_1 = arith.constant 0 : i32
    return %c0_i32, %c0_i32_0 : i32, i32
  }
  func.func @transform_6(%arg0: i32) -> (i32, i32) {
    %c0_i32 = arith.constant 0 : i32
    %c0_i32_0 = arith.constant 0 : i32
    return %arg0, %c0_i32 : i32, i32
  }
}

</mosaic_0001>

<bundles_post_ra>
// kernel: tpu_custom_call.1
= control target key start
LH: loop header
LB: loop body
LE: loop exit
PB: predicated region body
PF: predicated region fallthrough
CT: control target
= control target key end

     0   :  { %s2399_s0 = inlined_call_operand.hbm [shape: bf16[32,64], index: 0, kind: input, shape index: {}]   ;;  %s2400_s1 = inlined_call_operand.hbm [shape: bf16[64,192], index: 1, kind: input, shape index: {}]   ;;  %s2401_s2 = inlined_call_operand.vmem [shape: f32[1,192], index: 2, kind: input, shape index: {}]   ;;  %s2402_s3 = inlined_call_operand.hbm [shape: bf16[64,64], index: 3, kind: input, shape index: {}]   ;;  %s2403_s4 = inlined_call_operand.vmem [shape: f32[1,64], index: 4, kind: input, shape index: {}]   ;;  %s2404_s5 = inlined_call_operand.hbm [shape: f32[128,128], index: 5, kind: input, shape index: {}]   ;;  %s2405_s6 = inlined_call_operand.hbm [shape: f32[32,64], index: 6, kind: output, shape index: {}]  }
   0x1   :  { %2411 = sst [smem:[#allocation15_spill]] %s2400_s1 }
   0x2   :  { %11 = vsyncpa [#allocation3], 0 }
   0x3   :  { %13 = vsyncpa [#allocation3 + $0x1], 0 }
   0x4   :  { %14 = vsyncpa [#allocation6], 0 }
   0x5   :  { %15 = vsyncpa [#allocation9], 0 }
   0x6   :  { %16 = vsyncpa [#allocation4], 0 }
   0x7   :  { %18 = vsyncpa [#allocation4 + $0x1], 0  ;;  %s1954_s21 = smov 0   ;;  %s1956_s22 = smov 0  }
   0x8   :  { %s1958_s23 = smov 0   ;;  %s1960_s24 = smov 0  }
   0x9 LB: > { %s1975_s25 = sadd.s32 4294967295, %s1889_s24   ;;  %s1248_s26 = sadd.s32 4294967294, %s1889_s24   ;;  %s1889_s24 = sphi %s1960_s24, %s2434_s24   ;;  %s1885_s23 = sphi %s1958_s23, %s2433_s23   ;;  %s1881_s22 = sphi %s1956_s22, %s2432_s22   ;;  %s1877_s21 = sphi %s1954_s21, %s2431_s21  }
   0xa   : > { %p44_p0 = scmp.ne.s32.totalorder %s1881_s22, %s1877_s21  ;;  %p2406_p1 = scmp.eq.s32.totalorder %s1975_s25, 0 }
   0xb   : > { %p179_p3 = scmp.eq.s32.totalorder %s1248_s26, 1  ;;  %p1249_p5 = scmp.ge.s32.totalorder %s1889_s24, 1 }
   0xc   : > { %p1984_p4 = por %p2406_p1, %p44_p0  ;;  %p186_p7 = scmp.lt.s32.totalorder %s1889_s24, 3 }
   0xd   : > { %p1989_p6 = por %p179_p3, %p44_p0  ;;  %s1891_s30 = smov [#allocation5]  }
   0xe   : > { %s2412_s27 = scalar_select %p1984_p4, 1, 0 }
   0xf   : > { %s2413_s28 = scalar_select %p1989_p6, 1, 0 }
  0x10   : > { %p1994_p8 = pnand %p1249_p5, %p186_p7  ;;  %s198_s7 = sshll.u32 %s1891_s30, 4  ;;  %s1998_s7 = int_to_ptr.vmem [resolvable:$true] %s198_s7 }
  0x11   : > { %s1892_s9 = smov [#allocation7]   ;;  %s2416_s1 = sld [smem:[#allocation15_spill]] }
  0x12   : > { %s2414_s29 = scalar_select %p1994_p8, 1, 0 }
  0x13   : > { %p1431_p9 = pneg %p1994_p8  ;;  %s214_s10 = sshll.u32 %s1892_s9, 4  ;;  %s2009_s10 = int_to_ptr.vmem [resolvable:$true] %s214_s10 }
  0x15   : > { %p2005_p11 = pnand %p1431_p9, %p2406_p1 }
  0x17   : > { %s1701_s13 = scalar_lea.hbm %s2416_s1, 1024  ;;  %p2019_p13 = pneg %p2005_p11 }
  0x18   : > { %p1702_p12 = scmp.ne.s32.totalorder %s2416_s1, %s1701_s13  ;;  %p1708_p5 = scmp.lt.u32.totalorder %s1701_s13, %s2416_s1 }
  0x1a   : > { %p1704_p0 = pnand %p2019_p13, %p1702_p12 }
  0x1c   : > { %p1705_p3 = pneg %p1704_p0 }
  0x1e   : > { %p1710_p7 = pnand %p1708_p5, %p1705_p3 }
  0x20   : > { %1713 = shalt.err (!%p1710_p7)
}
  0x21   : > { %s1714_s19 = scalar_lea.vmem %s1998_s7, 1024  ;;  %p1722_p2 = scmp.lt.s32.totalorder %s1998_s7, %s1998_s7 }
  0x22   : > { %p1715_p9 = scmp.ne.s32.totalorder %s1998_s7, %s1714_s19  ;;  %p1723_p6 = scmp.lt.s32.totalorder %s1714_s19, %s1714_s19 }
  0x24   : > { %p1717_p10 = pnand %p1715_p9, %p2019_p13  ;;  %p1724_p12 = por %p1723_p6, %p1722_p2 }
  0x26   : > { %p1718_p1 = pneg %p1717_p10 }
  0x28   : > { %p1725_p0 = pnand %p1724_p12, %p1718_p1 }
  0x2a   : > { %1728 = shalt.err (!%p1725_p0)
}
  0x2b   : > { %s2407_s20 = smov 128   ;;  %s2408_s26 = smov 8  }
  0x2c   : > { %1434 = dma.hbm_to_vmem [thread:$0]  (!%p2005_p11), %s2416_s1, 1024, %s1998_s7, [#allocation6], %s2407_s20, %s2407_s20, %s2408_s26  }
  0x2d   : > { %s1729_s13 = scalar_lea.hbm %s2402_s3, 512 }
  0x2e   : > { %p1730_p1 = scmp.ne.s32.totalorder %s2402_s3, %s1729_s13  ;;  %p1736_p10 = scmp.lt.u32.totalorder %s1729_s13, %s2402_s3 }
  0x30   : > { %p1732_p2 = pnand %p1730_p1, %p2019_p13 }
  0x32   : > { %p1733_p6 = pneg %p1732_p2 }
  0x34   : > { %p1738_p3 = pnand %p1736_p10, %p1733_p6 }
  0x36   : > { %1741 = shalt.err (!%p1738_p3)
}
  0x37   : > { %s1742_s7 = scalar_lea.vmem %s2009_s10, 512  ;;  %p1750_p12 = scmp.lt.s32.totalorder %s2009_s10, %s2009_s10 }
  0x38   : > { %p1743_p5 = scmp.ne.s32.totalorder %s2009_s10, %s1742_s7  ;;  %p1751_p0 = scmp.lt.s32.totalorder %s1742_s7, %s1742_s7 }
  0x3a   : > { %p1745_p7 = pnand %p1743_p5, %p2019_p13  ;;  %p1752_p1 = por %p1751_p0, %p1750_p12 }
  0x3c   : > { %p1746_p9 = pneg %p1745_p7 }
  0x3e   : > { %p1753_p2 = pnand %p1752_p1, %p1746_p9 }
  0x40   : > { %1756 = shalt.err (!%p1753_p2)
}
  0x41   : > { %s1895_s19 = smov 64   ;;  %s1896_s30 = smov 4  }
  0x42   : > { %1437 = dma.hbm_to_vmem [thread:$0]  (!%p2005_p11), %s2402_s3, 512, %s2009_s10, [#allocation6], %s1895_s19, %s1895_s19, %s1896_s30  }
  0x43   : > { %s1897_s12 = smov [#allocation8]   ;;  %s2070_s14 = sadd.s32 1, %s1889_s24  }
  0x44   : > { %s230_s13 = sshll.u32 %s1897_s12, 4  ;;  %s1757_s18 = scalar_lea.hbm %s2404_s5, 2048  ;;  %s231_s13 = int_to_ptr.vmem [resolvable:$true] %s230_s13 }
  0x45   : > { %p1758_p6 = scmp.ne.s32.totalorder %s2404_s5, %s1757_s18  ;;  %p1764_p5 = scmp.lt.u32.totalorder %s1757_s18, %s2404_s5 }
  0x47   : > { %p1760_p10 = pnand %p1758_p6, %p2019_p13 }
  0x49   : > { %p1761_p3 = pneg %p1760_p10 }
  0x4b   : > { %p1766_p7 = pnand %p1764_p5, %p1761_p3 }
  0x4d   : > { %1769 = shalt.err (!%p1766_p7)
}
  0x4e   : > { %s1770_s10 = scalar_lea.vmem %s231_s13, 2048  ;;  %p1778_p1 = scmp.lt.s32.totalorder %s231_s13, %s231_s13 }
  0x4f   : > { %p1771_p9 = scmp.ne.s32.totalorder %s231_s13, %s1770_s10  ;;  %p1779_p2 = scmp.lt.s32.totalorder %s1770_s10, %s1770_s10 }
  0x51   : > { %p1773_p12 = pnand %p1771_p9, %p2019_p13  ;;  %p1780_p4 = por %p1779_p2, %p1778_p1 }
  0x53   : > { %p1774_p0 = pneg %p1773_p12 }
  0x55   : > { %p1781_p8 = pnand %p1780_p4, %p1774_p0 }
  0x57   : > { %1784 = shalt.err (!%p1781_p8)
}
  0x58   : > { %s2418_s20 = smov 8   ;;  %s2419_s9 = smov 128  }
  0x59   : > { %1440 = dma.hbm_to_vmem [thread:$0]  (!%p2005_p11), %s2404_s5, 2048, %s231_s13, [#allocation9], %s2419_s9, %s2419_s9, %s2418_s20  }
  0x5a   : > { %s28_s16 = ssub.s32 %s1889_s24, %s2070_s14  ;;  %s31_s8 = sadd.s32 1, %s1885_s23 }
  0x5b   : > { %p29_p4 = scmp.eq.s32.totalorder %s28_s16, 0  ;;  %p38_p8 = scmp.ne.s32.totalorder %s1885_s23, %s1881_s22 }
  0x5c   : > { %p39_p13 = scmp.eq.s32.totalorder %s1889_s24, 0  ;;  %p1452_p6 = scmp.lt.s32.totalorder %s1889_s24, 2 }
  0x5d   : > { %s2101_s11 = scalar_select %p29_p4, %s1885_s23, %s31_s8  }
  0x5e   : > { %p40_p10 = por %p39_p13, %p38_p8  ;;  %p2420_p3 = scmp.eq.s32.totalorder %s1975_s25, 1 }
  0x5f   : > { %s244_s15 = sand.u32 1, %s1885_s23   ;;  %s1292_s17 = sshll.u32 %s1889_s24, 7 }
  0x60   : > { %p2105_p5 = por %p2420_p3, %p38_p8  ;;  %s1254_s18 = sshll.u32 %s244_s15, 3 }
  0x61   : > { %s2114_s13 = scalar_lea.hbm %s2399_s0, %s1292_s17  ;;  %s248_s20 = scalar_lea.vmem [#allocation2], %s1254_s18 }
  0x62   : > { %s255_s9 = sshll.u32 %s248_s20, 4  ;;  %p2116_p11 = pnand %p1452_p6, %p40_p10  ;;  %s2120_s9 = int_to_ptr.vmem [resolvable:$true] %s255_s9 }
  0x63   : > { %s2122_s26 = scalar_lea.sflag [#allocation3], %s244_s15  ;;  %s1785_s16 = scalar_lea.hbm %s2114_s13, 128 }
  0x64   : > { %p1786_p7 = scmp.ne.s32.totalorder %s2114_s13, %s1785_s16  ;;  %p1787_p9 = pneg %p2116_p11 }
  0x65   : > { %s1790_s18 = scalar_lea.hbm %s2399_s0, 256  ;;  %p1791_p1 = scmp.lt.u32.totalorder %s2114_s13, %s2399_s0 }
  0x66   : > { %p1788_p12 = pnand %p1787_p9, %p1786_p7  ;;  %p1792_p2 = scmp.lt.u32.totalorder %s1790_s18, %s1785_s16 }
  0x67   : > { %p1794_p8 = scmp.lt.u32.totalorder %s1785_s16, %s2114_s13 }
  0x68   : > { %p1789_p0 = pneg %p1788_p12  ;;  %p1793_p4 = por %p1792_p2, %p1791_p1 }
  0x6a   : > { %p1795_p13 = por %p1794_p8, %p1793_p4 }
  0x6c   : > { %p1796_p6 = pnand %p1795_p13, %p1789_p0 }
  0x6e   : > { %1799 = shalt.err (!%p1796_p6)
}
  0x6f   : > { %s1800_s15 = scalar_lea.vmem %s2120_s9, 128  ;;  %s1898_s20 = smov [#allocation2]  }
  0x70   : > { %p1801_p10 = scmp.ne.s32.totalorder %s2120_s9, %s1800_s15  ;;  %s1805_s8 = sshll.u32 %s1898_s20, 4  ;;  %s1806_s8 = int_to_ptr.vmem [resolvable:$false] %s1805_s8 }
  0x71   : > { %s1807_s17 = scalar_lea.vmem %s1806_s8, 256  ;;  %p1808_p12 = scmp.lt.s32.totalorder %s2120_s9, %s1806_s8 }
  0x72   : > { %p1803_p3 = pnand %p1801_p10, %p1787_p9  ;;  %p1809_p1 = scmp.lt.s32.totalorder %s1807_s17, %s1800_s15 }
  0x74   : > { %p1804_p7 = pneg %p1803_p3  ;;  %p1810_p2 = por %p1809_p1, %p1808_p12 }
  0x76   : > { %p1811_p4 = pnand %p1810_p2, %p1804_p7 }
  0x78   : > { %1814 = shalt.err (!%p1811_p4)
}
  0x79   : > { %1444 = dma.hbm_to_vmem [thread:$0]  (!%p2116_p11), %s2114_s13, 128, %s2120_s9, %s2122_s26, %s1895_s19, %s1895_s19, %s1896_s30  }
  0x7a   : > { %p2423_p9 = scmp.ne.s32.totalorder %s2414_s29, 0 }
  0x7b   : > { %s2156_s16 = sand.u32 (!%p2423_p9), 1, %s1881_s22   ;;  %p2424_p0 = scmp.ne.s32.totalorder (!%p2423_p9), %s2412_s27, 0 }
  0x7c   : > { %267 = sbr.rel (%p2423_p9) target bundleno = 1654 (0x676), region = 44  ;;  %s1258_s18 = sshll.u32 (!%p2423_p9), %s2156_s16, 3 }
  0x7d   : > { %s270_s7 = scalar_lea.sflag (!%p2423_p9), [#allocation3], %s2156_s16  ;;  %s273_s10 = scalar_lea.vmem (!%p2423_p9), [#allocation2], %s1258_s18 }
  0x83   : > { %1860 = dma.done.wait (%p2424_p0), %s270_s7, 128  }
  0x84   : > { %1862 = vsyncadd (%p2424_p0), %s270_s7, 4294967168  ;;  %p2425_p8 = scmp.eq.s32.totalorder %s1975_s25, 0 }
  0x86   : > { %1864 = dma.done.wait (%p2425_p8), [#allocation6], 1536   ;;  %p2426_p11 = pmov %p2425_p8 }
  0x87   : > { %p2427_p13 = pmov %p2425_p8 }
  0x88   : > { %1866 = vsyncadd (%p2426_p11), [#allocation6], 4294965760 }
  0x89   : > { %1868 = dma.done.wait (%p2427_p13), [#allocation9], 2048   ;;  %p2428_p6 = pmov %p2425_p8 }
  0x8a   : > { %v1899_v0 = vmov 0   ;;  %v1620_v1 = vld [vmem:[#allocation5 + $0x4] ss:$8 sps:$4 sm:$0xff]   ;;  %v1622_v2 = vld [vmem:[#allocation5] ss:$8 sps:$4 sm:$0xff]   ;;  %v1632_v9 = vld [vmem:[%s273_s10] sm:$0xff]   ;;  %v329_v10 = vlaneseq }
  0x8b   : > { %1870 = vsyncadd (%p2428_p6), [#allocation9], 4294965248  ;;  %420 = vmatprep.mubr.bf16.mxu0 %v1899_v0  ;;  %388 = vmatprep.subr.bf16.mxu0 %v1620_v1  ;;  %v1623_v3 = vld [vmem:[#allocation5 + $0x14] ss:$8 sps:$4 sm:$0xff]   ;;  %v1625_v4 = vld [vmem:[#allocation5 + $0x10] ss:$8 sps:$4 sm:$0xff]  }
  0x8c   : > { %389 = vmatpush1.bf16.msra.mxu0 %v1622_v2  ;;  %v1626_v5 = vld [vmem:[#allocation5 + $0x24] ss:$8 sps:$4 sm:$0xff]   ;;  %v1628_v6 = vld [vmem:[#allocation5 + $0x20] ss:$8 sps:$4 sm:$0xff]   ;;  %v1629_v7 = vld [vmem:[#allocation5 + $0x34] ss:$8 sps:$4 sm:$0xff]  }
  0x8d   : > { %390 = vmatprep.subr.bf16.mxu0 %v1623_v3  ;;  %v1631_v8 = vld [vmem:[#allocation5 + $0x30] ss:$8 sps:$4 sm:$0xff]   ;;  %vm384_vm0 = vcmask 523264   ;;  %v330_v11 = vshrl.u32 %v329_v10, 7  ;;  %vm567_vm1 = vcmask 64512   ;;  %s1900_s19 = smov 104  }
  0x8e   : > { %v327_v13 = vld [vmem:[%s2401_s2] sm:$0x3]  ;;  %s1901_s30 = smov 120   ;;  %s1902_s13 = smov 96   ;;  %vm1914_vm2 = vmmov 0   ;;  %vm1028_vm3 = vcmask 130048  }
  0x8f   : > { %v331_v12 = vsub.s32 0, %v330_v11  ;;  %v335_v14 = vsub.s32 1, %v330_v11  ;;  %s1903_s9 = smov 112   ;;  %s1904_s1 = smov 80   ;;  %vm1031_vm4 = vcmask 195584   ;;  %vm1034_vm5 = vcmask 261120  }
  0x90   : > { %391 = vmatpush1.bf16.msra.mxu0 %v1625_v4  ;;  %s1905_s26 = smov 88   ;;  %s1906_s15 = smov 72   ;;  %vm1037_vm6 = vcmask 326656   ;;  %vm1040_vm7 = vcmask 392192   ;;  %vm1043_vm8 = vcmask 457728  }
  0x91   : > { %392 = vmatprep.subr.bf16.mxu0 %v1626_v5  ;;  %v332_v15 = vrot.slane %v327_v13, %v331_v12  ;;  %v336_v17 = vrot.slane %v327_v13, %v335_v14  ;;  %s1907_s20 = smov 64   ;;  %s1909_s8 = smov 8  }
  0x92   : > { %s1910_s17 = smov 24   ;;  %s1911_s18 = smov 16  }
  0x93   : > { %s1912_s7 = smov 40   ;;  %s1913_s10 = smov 32  }
  0x94   : > { %393 = vmatpush1.bf16.msra.mxu0 %v1628_v6  ;;  %s1915_s27 = smov 56   ;;  %s1916_s29 = smov 48  }
  0x95   : > { %394 = vmatprep.subr.bf16.mxu0 %v1629_v7 }
  0x98   : > { %395 = vmatpush1.bf16.msra.mxu0 %v1631_v8 }
  0x9b   : > { %1272 = vmatmul.mubr.msk.bf16.vlgmr.msra.gmra.mrb[0].mxu0 %vm384_vm0, %v1632_v9 }
 0x16e   : > { %v422_v16 = vpop.f32.mrb[0].mxu0 }
 0x16f   : > { %v424_v18 = vpop.f32.mrb[1].mxu0  ;;  %v423_v20 = vadd.f32 %v422_v16, %v332_v15 }
 0x170   : > { %v426_v19 = vpop.f32.mrb[2].mxu0  ;;  %v425_v23 = vadd.f32 %v424_v18, %v336_v17 }
 0x171   : > { %v427_v21 = vadd.f32 %v426_v19, %v332_v15  ;;  %v428_v22 = vpop.f32.mrb[3].mxu0 }
 0x172   : > { %v429_v24 = vadd.f32 %v428_v22, %v336_v17 }
 0x173   : > { %v1525_v25 = vpack.i.bf16 %v427_v21, %v423_v20  ;;  %v475_v26 = vpack.c.bf16 %v427_v21, %v423_v20 }
 0x174   : > { %v833_v27 = vpack.c.bf16 %v429_v24, %v425_v23  ;;  %v2178_v28 = vpack.i.bf16 %v429_v24, %v425_v23 }
 0x175   : > { %1526 = vrot.lane.b32.xlu1 %v1525_v25, %s1900_s19  ;;  %1516 = vrot.lane.b32.xlu0 %v1525_v25, %s1901_s30 }
 0x176   : > { %1347 = vmatprep.mubr.msk.bf16.mxu1 %vm567_vm1, %v475_v26  ;;  %1363 = vmatprep.subr.bf16.mxu0 %v833_v27 }
 0x177   : > { %1364 = vmatpush3.bf16.msra.mxu0 %v833_v27 }
 0x179   : > { %1531 = vrot.lane.b32.xlu1 %v1525_v25, %s1902_s13  ;;  %1521 = vrot.lane.b32.xlu0 %v1525_v25, %s1903_s9 }
 0x17d   : > { %1541 = vrot.lane.b32.xlu1 %v1525_v25, %s1904_s1  ;;  %1536 = vrot.lane.b32.xlu0 %v1525_v25, %s1905_s26 }
 0x181   : > { %1546 = vrot.lane.b32.xlu0 %v1525_v25, %s1906_s15  ;;  %551 = vrot.lane.b32.xlu1 %v475_v26, %s1907_s20 }
 0x1e7   : > { %v1527_v29 = vpop.permute.xlu1 %1526  ;;  %v1517_v30 = vpop.permute.xlu0 %1516 }
 0x1e8   : > { %v1519_v31 = vunpack.i.h.bf16 %v1517_v30  ;;  %v1518_v32 = vunpack.i.l.bf16 %v1517_v30  ;;  %v1529_v33 = vunpack.i.h.bf16 %v1527_v29  ;;  %v1528_v34 = vunpack.i.l.bf16 %v1527_v29 }
 0x1ea   : > { %v2187_v35 = vpack.c.bf16 %v1519_v31, %v1518_v32  ;;  %v2191_v40 = vpack.c.bf16 %v1529_v33, %v1528_v34  ;;  %v529_v34 = vld [vmem:[#allocation8 + $0x10] sm:$0xff] }
 0x1eb   : > { %v1532_v36 = vpop.permute.xlu1 %1531  ;;  %v1522_v37 = vpop.permute.xlu0 %1521 }
 0x1ec   : > { %v1524_v38 = vunpack.i.h.bf16 %v1522_v37  ;;  %v1523_v39 = vunpack.i.l.bf16 %v1522_v37  ;;  %553 = vrot.lane.b32.xlu0 %v2187_v35, %s1907_s20  ;;  %v1534_v41 = vunpack.i.h.bf16 %v1532_v36  ;;  %v1533_v42 = vunpack.i.l.bf16 %v1532_v36 }
 0x1ee   : > { %v2193_v43 = vpack.c.bf16 %v1524_v38, %v1523_v39  ;;  %v2199_v48 = vpack.c.bf16 %v1534_v41, %v1533_v42  ;;  %v528_v39 = vld [vmem:[#allocation8 + $0x8] sm:$0xff]  ;;  %v530_v42 = vld [vmem:[#allocation8 + $0x18] sm:$0xff] }
 0x1ef   : > { %v1542_v44 = vpop.permute.xlu1 %1541  ;;  %v1537_v45 = vpop.permute.xlu0 %1536 }
 0x1f0   : > { %v1539_v46 = vunpack.i.h.bf16 %v1537_v45  ;;  %v1538_v47 = vunpack.i.l.bf16 %v1537_v45  ;;  %557 = vrot.lane.b32.xlu0 %v2191_v40, %s1907_s20  ;;  %555 = vrot.lane.b32.xlu1 %v2193_v43, %s1907_s20  ;;  %v1544_v49 = vunpack.i.h.bf16 %v1542_v44  ;;  %v1543_v50 = vunpack.i.l.bf16 %v1542_v44 }
 0x1f2   : > { %v2201_v51 = vpack.c.bf16 %v1539_v46, %v1538_v47  ;;  %v2209_v57 = vpack.c.bf16 %v1544_v49, %v1543_v50  ;;  %v533_v46 = vld [vmem:[#allocation8 + $0x30] sm:$0xff]  ;;  %v531_v47 = vld [vmem:[#allocation8 + $0x20] sm:$0xff] }
 0x1f3   : > { %v1547_v52 = vpop.permute.xlu0 %1546  ;;  %v552_v53 = vpop.permute.xlu1 %551 }
 0x1f4   : > { %v1549_v54 = vunpack.i.h.bf16 %v1547_v52  ;;  %v1548_v55 = vunpack.i.l.bf16 %v1547_v52  ;;  %561 = vrot.lane.b32.xlu0 %v2201_v51, %s1907_s20  ;;  %559 = vrot.lane.b32.xlu1 %v2199_v48, %s1907_s20  ;;  %v593_v56 = vsel %vm567_vm1, %v552_v53, 0 }
 0x1f5   : > { %1407 = vmatprep.subr.msk.bf16.mxu1 %vm567_vm1, %v552_v53 }
 0x1f6   : > { %v2211_v58 = vpack.c.bf16 %v1549_v54, %v1548_v55  ;;  %1332 = vmatpush3.bf16.xpose.msra.mxu1 %v593_v56  ;;  %v534_v54 = vld [vmem:[#allocation8 + $0x38] sm:$0xff] }
 0x1f8   : > { %565 = vrot.lane.b32.xlu0 %v2211_v58, %s1907_s20  ;;  %563 = vrot.lane.b32.xlu1 %v2209_v57, %s1907_s20 }
 0x1fc   : > { %1551 = vrot.lane.b32.xlu0 %v2178_v28, %s1901_s30  ;;  %1556 = vrot.lane.b32.xlu1 %v2178_v28, %s1903_s9 }
 0x200   : > { %1561 = vrot.lane.b32.xlu0 %v2178_v28, %s1900_s19  ;;  %1566 = vrot.lane.b32.xlu1 %v2178_v28, %s1902_s13  ;;  %s1262_s19 = sshll.u32 %s2156_s16, 4 }
 0x201   : > { %s313_s9 = scalar_lea.vmem [#allocation10], %s1262_s19 }
 0x204   : > { %1571 = vrot.lane.b32.xlu0 %v2178_v28, %s1905_s26  ;;  %1576 = vrot.lane.b32.xlu1 %v2178_v28, %s1904_s1  ;;  %s1146_s1 = sshll.u32 %s313_s9, 4  ;;  %s1293_s26 = sshll.u32 %s1975_s25, 8  ;;  %s2347_s1 = int_to_ptr.vmem [resolvable:$true] %s1146_s1 }
 0x205   : > { %s1133_s25 = scalar_lea.sflag [#allocation4], %s2156_s16 }
 0x25e   : > { %v554_v59 = vpop.permute.xlu0 %553 }
 0x25f   : > { %1408 = vmatprep.subr.msk.bf16.mxu1 %vm567_vm1, %v554_v59  ;;  %v596_v60 = vsel %vm567_vm1, %v554_v59, 0  ;;  %v535_v59 = vld [vmem:[#allocation8 + $0x40] sm:$0xff] }
 0x260   : > { %1334 = vmatpush3.bf16.xpose.msra.mxu1 %v596_v60 }
 0x262   : > { %v558_v61 = vpop.permute.xlu0 %557  ;;  %v556_v62 = vpop.permute.xlu1 %555 }
 0x263   : > { %1409 = vmatprep.subr.msk.bf16.mxu1 %vm567_vm1, %v556_v62  ;;  %v599_v1 = vsel %vm567_vm1, %v556_v62, 0  ;;  %v602_v6 = vsel %vm567_vm1, %v558_v61, 0 }
 0x266   : > { %v562_v63 = vpop.permute.xlu0 %561  ;;  %v560_v0 = vpop.permute.xlu1 %559 }
 0x267   : > { %v605_v20 = vsel %vm567_vm1, %v560_v0, 0  ;;  %v608_v30 = vsel %vm567_vm1, %v562_v63, 0 }
 0x268   : > { %1336 = vmatpush3.bf16.xpose.msra.mxu1 %v599_v1 }
 0x269   : > { %1410 = vmatprep.subr.msk.bf16.mxu1 %vm567_vm1, %v558_v61 }
 0x26a   : > { %v566_v2 = vpop.permute.xlu0 %565  ;;  %v564_v3 = vpop.permute.xlu1 %563 }
 0x26b   : > { %v611_v32 = vsel %vm567_vm1, %v564_v3, 0  ;;  %v614_v33 = vsel %vm567_vm1, %v566_v2, 0 }
 0x26e   : > { %v1552_v4 = vpop.permute.xlu0 %1551  ;;  %v1557_v5 = vpop.permute.xlu1 %1556 }
 0x26f   : > { %v1554_v7 = vunpack.i.h.bf16 %v1552_v4  ;;  %v1553_v8 = vunpack.i.l.bf16 %v1552_v4  ;;  %v1559_v9 = vunpack.i.h.bf16 %v1557_v5  ;;  %v1558_v10 = vunpack.i.l.bf16 %v1557_v5 }
 0x270   : > { %1338 = vmatpush3.bf16.xpose.msra.mxu1 %v602_v6  ;;  %v541_v6 = vld [vmem:[#allocation8 + $0x70] sm:$0xff] }
 0x271   : > { %v834_v11 = vpack.c.bf16 %v1554_v7, %v1553_v8  ;;  %1411 = vmatprep.subr.msk.bf16.mxu1 %vm567_vm1, %v560_v0  ;;  %v835_v13 = vpack.c.bf16 %v1559_v9, %v1558_v10  ;;  %v539_v7 = vld [vmem:[#allocation8 + $0x60] sm:$0xff] }
 0x272   : > { %v1562_v12 = vpop.permute.xlu0 %1561  ;;  %v1567_v16 = vpop.permute.xlu1 %1566 }
 0x273   : > { %v1564_v14 = vunpack.i.h.bf16 %v1562_v12  ;;  %v1563_v15 = vunpack.i.l.bf16 %v1562_v12  ;;  %1365 = vmatprep.subr.bf16.mxu0 %v834_v11  ;;  %v1569_v18 = vunpack.i.h.bf16 %v1567_v16  ;;  %v1568_v19 = vunpack.i.l.bf16 %v1567_v16 }
 0x274   : > { %1366 = vmatpush3.bf16.msra.mxu0 %v834_v11  ;;  %v540_v11 = vld [vmem:[#allocation8 + $0x68] sm:$0xff] }
 0x275   : > { %1367 = vmatprep.subr.bf16.mxu0 %v835_v13  ;;  %v836_v17 = vpack.c.bf16 %v1564_v14, %v1563_v15  ;;  %v837_v22 = vpack.c.bf16 %v1569_v18, %v1568_v19  ;;  %v542_v14 = vld [vmem:[#allocation8 + $0x78] sm:$0xff] }
 0x276   : > { %v1572_v21 = vpop.permute.xlu0 %1571  ;;  %v1577_v25 = vpop.permute.xlu1 %1576 }
 0x277   : > { %v1574_v23 = vunpack.i.h.bf16 %v1572_v21  ;;  %v1573_v24 = vunpack.i.l.bf16 %v1572_v21  ;;  %v1579_v27 = vunpack.i.h.bf16 %v1577_v25  ;;  %v1578_v29 = vunpack.i.l.bf16 %v1577_v25 }
 0x278   : > { %1340 = vmatpush3.bf16.xpose.msra.mxu1 %v605_v20  ;;  %1368 = vmatpush3.bf16.msra.mxu0 %v835_v13 }
 0x279   : > { %1412 = vmatprep.subr.msk.bf16.mxu1 %vm567_vm1, %v562_v63  ;;  %1369 = vmatprep.subr.bf16.mxu0 %v836_v17  ;;  %v838_v26 = vpack.c.bf16 %v1574_v23, %v1573_v24  ;;  %v839_v31 = vpack.c.bf16 %v1579_v27, %v1578_v29  ;;  %v536_v63 = vld [vmem:[#allocation8 + $0x48] sm:$0xff] }
 0x27c   : > { %1370 = vmatpush3.bf16.msra.mxu0 %v836_v17 }
 0x27d   : > { %1371 = vmatprep.subr.bf16.mxu0 %v837_v22 }
 0x280   : > { %1342 = vmatpush3.bf16.xpose.msra.mxu1 %v608_v30  ;;  %1372 = vmatpush3.bf16.msra.mxu0 %v837_v22 }
 0x281   : > { %1413 = vmatprep.subr.msk.bf16.mxu1 %vm567_vm1, %v564_v3  ;;  %1373 = vmatprep.subr.bf16.mxu0 %v838_v26 }
 0x284   : > { %1374 = vmatpush3.bf16.msra.mxu0 %v838_v26 }
 0x285   : > { %1375 = vmatprep.subr.bf16.mxu0 %v839_v31 }
 0x288   : > { %1344 = vmatpush3.bf16.xpose.msra.mxu1 %v611_v32  ;;  %1376 = vmatpush3.bf16.msra.mxu0 %v839_v31 }
 0x289   : > { %1414 = vmatprep.subr.msk.bf16.mxu1 %vm567_vm1, %v566_v2  ;;  %v538_v2 = vld [vmem:[#allocation8 + $0x58] sm:$0xff] }
 0x290   : > { %1346 = vmatpush3.bf16.xpose.msra.mxu1 %v614_v33 }
 0x297   : > { %1348 = vmatmul.mubr.msk.bf16.vlgmr.msra.gmra.mrb[0].mxu1 %vm567_vm1, %v2187_v35  ;;  %v527_v35 = vld [vmem:[#allocation8] sm:$0xff] }
 0x298   : > { %1351 = vmatprep.mubr.msk.bf16.mxu1 %vm567_vm1, %v2193_v43 }
 0x29f   : > { %1352 = vmatmul.mubr.msk.bf16.gmra.mrb[4].mxu1 %vm567_vm1, %v2191_v40 }
 0x2a0   : > { %1355 = vmatprep.mubr.msk.bf16.mxu1 %vm567_vm1, %v2199_v48 }
 0x2a7   : > { %1356 = vmatmul.mubr.msk.bf16.gmra.mrb[8].mxu1 %vm567_vm1, %v2201_v51  ;;  %v532_v51 = vld [vmem:[#allocation8 + $0x28] sm:$0xff] }
 0x2a8   : > { %1359 = vmatprep.mubr.msk.bf16.mxu1 %vm567_vm1, %v2209_v57 }
 0x2af   : > { %1360 = vmatmul.mubr.msk.bf16.gmra.mrb[12].mxu1 %vm567_vm1, %v2211_v58  ;;  %v537_v58 = vld [vmem:[#allocation8 + $0x50] sm:$0xff] }
 0x36a   : > { %v1349_v36 = vpop.f32.mrb[0].mxu1 }
 0x36b   : > { %v2257_v37 = vadd.f32 %v1349_v36, %v529_v34  ;;  %v650_v38 = vpop.f32.mrb[1].mxu1 }
 0x36c   : > { %v2259_v40 = vadd.f32 %v650_v38, %v527_v35  ;;  %v1350_v41 = vpop.f32.mrb[2].mxu1 }
 0x36d   : > { %717 = vmax.xlane.f32.xlu0 %v2257_v37  ;;  %v653_v43 = vpop.f32.mrb[3].mxu1  ;;  %v2265_v45 = vadd.f32 %v1350_v41, %v530_v42 }
 0x36e   : > { %v2262_v44 = vadd.f32 %v653_v43, %v528_v39  ;;  %713 = vmax.xlane.f32.xlu1 %v2259_v40 }
 0x371   : > { %715 = vmax.xlane.f32.xlu0 %v2262_v44 }
 0x372   : > { %v1353_v48 = vpop.f32.mrb[4].mxu1  ;;  %719 = vmax.xlane.f32.xlu1 %v2265_v45 }
 0x373   : > { %v2269_v49 = vadd.f32 %v1353_v48, %v533_v46  ;;  %v666_v50 = vpop.f32.mrb[5].mxu1 }
 0x374   : > { %v2271_v52 = vadd.f32 %v666_v50, %v531_v47  ;;  %v1354_v53 = vpop.f32.mrb[6].mxu1 }
 0x375   : > { %v669_v55 = vpop.f32.mrb[7].mxu1  ;;  %725 = vmax.xlane.f32.xlu0 %v2269_v49  ;;  %v2277_v57 = vadd.f32 %v1354_v53, %v534_v54 }
 0x376   : > { %v2274_v56 = vadd.f32 %v669_v55, %v532_v51  ;;  %721 = vmax.xlane.f32.xlu1 %v2271_v52 }
 0x379   : > { %723 = vmax.xlane.f32.xlu0 %v2274_v56 }
 0x37a   : > { %v1357_v60 = vpop.f32.mrb[8].mxu1  ;;  %727 = vmax.xlane.f32.xlu1 %v2277_v57 }
 0x37b   : > { %v2281_v61 = vadd.f32 %v1357_v60, %v537_v58  ;;  %v682_v62 = vpop.f32.mrb[9].mxu1 }
 0x37c   : > { %v2283_v0 = vadd.f32 %v682_v62, %v535_v59  ;;  %v1358_v1 = vpop.f32.mrb[10].mxu1 }
 0x37d   : > { %v685_v3 = vpop.f32.mrb[11].mxu1  ;;  %733 = vmax.xlane.f32.xlu0 %v2281_v61  ;;  %v2289_v5 = vadd.f32 %v1358_v1, %v538_v2 }
 0x37e   : > { %v2286_v4 = vadd.f32 %v685_v3, %v536_v63  ;;  %729 = vmax.xlane.f32.xlu1 %v2283_v0 }
 0x381   : > { %731 = vmax.xlane.f32.xlu0 %v2286_v4 }
 0x382   : > { %v1361_v8 = vpop.f32.mrb[12].mxu1  ;;  %735 = vmax.xlane.f32.xlu1 %v2289_v5 }
 0x383   : > { %v2293_v9 = vadd.f32 %v1361_v8, %v541_v6  ;;  %v698_v10 = vpop.f32.mrb[13].mxu1 }
 0x384   : > { %v2295_v12 = vadd.f32 %v698_v10, %v539_v7  ;;  %v1362_v13 = vpop.f32.mrb[14].mxu1 }
 0x385   : > { %v701_v15 = vpop.f32.mrb[15].mxu1  ;;  %741 = vmax.xlane.f32.xlu0 %v2293_v9  ;;  %v2301_v17 = vadd.f32 %v1362_v13, %v542_v14 }
 0x386   : > { %v2298_v16 = vadd.f32 %v701_v15, %v540_v11  ;;  %737 = vmax.xlane.f32.xlu1 %v2295_v12 }
 0x389   : > { %739 = vmax.xlane.f32.xlu0 %v2298_v16 }
 0x38a   : > { %743 = vmax.xlane.f32.xlu1 %v2301_v17 }
 0x39f   : > { %1581 = vrot.lane.b32.xlu0 %v2178_v28, %s1906_s15 }
 0x3fa   : > { %v718_v18 = vpop.xlane.xlu0 %717 }
 0x3fb   : > { %v747_v19 = vsub.f32 %v2257_v37, %v718_v18  ;;  %v714_v20 = vpop.xlane.xlu1 %713 }
 0x3fc   : > { %v745_v21 = vsub.f32 %v2259_v40, %v714_v20 }
 0x3fd   : > { %v765_v22 = vmul.f32 1.442695, %v747_v19 }
 0x3fe   : > { %v761_v23 = vmul.f32 1.442695, %v745_v21  ;;  %v716_v24 = vpop.xlane.xlu0 %715 }
 0x3ff   : > { %1637 = vpow2.f32 %v765_v22  ;;  %v746_v25 = vsub.f32 %v2262_v44, %v716_v24  ;;  %v720_v26 = vpop.xlane.xlu1 %719 }
 0x400   : > { %v748_v27 = vsub.f32 %v2265_v45, %v720_v26  ;;  %1639 = vpow2.f32 %v761_v23 }
 0x401   : > { %v763_v29 = vmul.f32 1.442695, %v746_v25 }
 0x402   : > { %v767_v30 = vmul.f32 1.442695, %v748_v27  ;;  %v726_v31 = vpop.xlane.xlu0 %725 }
 0x403   : > { %1641 = vpow2.f32 %v763_v29  ;;  %v751_v28 = vsub.f32 %v2269_v49, %v726_v31  ;;  %v722_v32 = vpop.xlane.xlu1 %721  ;;  %v1633_v31 = vld [vmem:[#allocation7] sm:$0xff]  }
 0x404   : > { %1643 = vpow2.f32 %v767_v30  ;;  %v749_v33 = vsub.f32 %v2271_v52, %v722_v32 }
 0x405   : > { %v773_v34 = vmul.f32 1.442695, %v751_v28  ;;  %v1908_v28 = vmov 0.0  }
 0x406   : > { %v724_v35 = vpop.xlane.xlu0 %723  ;;  %v769_v37 = vmul.f32 1.442695, %v749_v33 }
 0x407   : > { %1645 = vpow2.f32 %v773_v34  ;;  %v728_v36 = vpop.xlane.xlu1 %727  ;;  %v750_v44 = vsub.f32 %v2274_v56, %v724_v35 }
 0x408   : > { %v752_v38 = vsub.f32 %v2277_v57, %v728_v36  ;;  %1647 = vpow2.f32 %v769_v37 }
 0x409   : > { %v1638_v39 = vpop.eup %1637  ;;  %v771_v51 = vmul.f32 1.442695, %v750_v44 }
 0x40a   : > { %v734_v40 = vpop.xlane.xlu0 %733  ;;  %797 = vadd.xlane.f32.xlu1 %v1638_v39  ;;  %v775_v41 = vmul.f32 1.442695, %v752_v38  ;;  %v1640_v43 = vpop.eup %1639 }
 0x40b   : > { %v730_v42 = vpop.xlane.xlu1 %729  ;;  %v755_v52 = vsub.f32 %v2281_v61, %v734_v40 }
 0x40c   : > { %v753_v45 = vsub.f32 %v2283_v0, %v730_v42  ;;  %1649 = vpow2.f32 %v775_v41  ;;  %v1634_v42 = vld [vmem:[#allocation7 + $0x8] sm:$0xff]  }
 0x40d   : > { %v2316_v46 = vpop.eup %1641  ;;  %v781_v56 = vmul.f32 1.442695, %v755_v52 }
 0x40e   : > { %v1644_v47 = vpop.eup %1643  ;;  %v777_v48 = vmul.f32 1.442695, %v753_v45  ;;  %v732_v49 = vpop.xlane.xlu0 %731  ;;  %v825_v50 = vpack.c.bf16 %v2316_v46, %v1640_v43 }
 0x40f   : > { %799 = vadd.xlane.f32.xlu1 %v1644_v47  ;;  %v736_v54 = vpop.xlane.xlu1 %735  ;;  %v754_v58 = vsub.f32 %v2286_v4, %v732_v49  ;;  %v826_v15 = vpack.c.bf16 %v1644_v47, %v1638_v39 }
 0x410   : > { %1651 = vpow2.f32 %v777_v48  ;;  %1379 = vmatprep.mubr.bf16.mxu0 %v825_v50  ;;  %v756_v57 = vsub.f32 %v2289_v5, %v736_v54 }
 0x411   : > { %v1646_v53 = vpop.eup %1645  ;;  %1653 = vpow2.f32 %v771_v51  ;;  %v779_v0 = vmul.f32 1.442695, %v754_v58 }
 0x412   : > { %v742_v55 = vpop.xlane.xlu0 %741  ;;  %v1648_v59 = vpop.eup %1647  ;;  %1655 = vpow2.f32 %v781_v56  ;;  %v783_v62 = vmul.f32 1.442695, %v756_v57  ;;  %v1635_v57 = vld [vmem:[#allocation7 + $0x10] sm:$0xff]  }
 0x413   : > { %805 = vadd.xlane.f32.xlu1 %v1646_v53  ;;  %v738_v2 = vpop.xlane.xlu1 %737  ;;  %v759_v7 = vsub.f32 %v2293_v9, %v742_v55 }
 0x414   : > { %1657 = vpow2.f32 %v783_v62  ;;  %v757_v10 = vsub.f32 %v2295_v12, %v738_v2 }
 0x415   : > { %1659 = vpow2.f32 %v779_v0  ;;  %v789_v11 = vmul.f32 1.442695, %v759_v7 }
 0x416   : > { %v740_v60 = vpop.xlane.xlu0 %739  ;;  %v1650_v63 = vpop.eup %1649  ;;  %v785_v20 = vmul.f32 1.442695, %v757_v10 }
 0x417   : > { %801 = vadd.xlane.f32.xlu1 %v1648_v59  ;;  %v758_v4 = vsub.f32 %v2298_v16, %v740_v60  ;;  %v744_v14 = vpop.xlane.xlu1 %743  ;;  %1661 = vpow2.f32 %v789_v11  ;;  %v828_v22 = vpack.c.bf16 %v1650_v63, %v1646_v53 }
 0x418   : > { %v760_v9 = vsub.f32 %v2301_v17, %v744_v14 }
 0x419   : > { %v787_v13 = vmul.f32 1.442695, %v758_v4  ;;  %v1636_v4 = vld [vmem:[#allocation7 + $0x18] sm:$0xff]  }
 0x41a   : > { %v1652_v61 = vpop.eup %1651  ;;  %v1582_v1 = vpop.permute.xlu0 %1581  ;;  %v791_v21 = vmul.f32 1.442695, %v760_v9 }
 0x41b   : > { %v1584_v3 = vunpack.i.h.bf16 %v1582_v1  ;;  %v1583_v6 = vunpack.i.l.bf16 %v1582_v1  ;;  %807 = vadd.xlane.f32.xlu1 %v1650_v63  ;;  %809 = vadd.xlane.f32.xlu0 %v1652_v61  ;;  %v1654_v8 = vpop.eup %1653  ;;  %1663 = vpow2.f32 %v787_v13 }
 0x41c   : > { %v1656_v18 = vpop.eup %1655  ;;  %v827_v19 = vpack.c.bf16 %v1654_v8, %v1648_v59  ;;  %1665 = vpow2.f32 %v785_v20 }
 0x41d   : > { %v840_v5 = vpack.c.bf16 %v1584_v3, %v1583_v6  ;;  %1667 = vpow2.f32 %v791_v21 }
 0x41e   : > { %v1658_v16 = vpop.eup %1657 }
 0x41f   : > { %1377 = vmatprep.subr.bf16.mxu0 %v840_v5  ;;  %803 = vadd.xlane.f32.xlu1 %v1654_v8  ;;  %v1660_v12 = vpop.eup %1659  ;;  %v830_v27 = vpack.c.bf16 %v1658_v16, %v1656_v18 }
 0x420   : > { %793 = vadd.xlane.f32.xlu0 %v1640_v43  ;;  %1378 = vmatpush3.bf16.msra.mxu0 %v840_v5  ;;  %v829_v23 = vpack.c.bf16 %v1660_v12, %v1652_v61 }
 0x421   : > { %v1662_v24 = vpop.eup %1661  ;;  %1395 = vmatprep.subr.bf16.mxu0 %v1908_v28 }
 0x423   : > { %1380 = vmatmul.mubr.bf16.vlgmr.msra.gmra.mrb[4].mxu0 %v826_v15  ;;  %813 = vadd.xlane.f32.xlu1 %v1656_v18 }
 0x424   : > { %1383 = vmatprep.mubr.bf16.mxu0 %v827_v19  ;;  %1396 = vmatpush3.bf16.msra.mxu0 %v1633_v31 }
 0x425   : > { %v1664_v25 = vpop.eup %1663  ;;  %1397 = vmatprep.subr.bf16.mxu0 %v1908_v28 }
 0x426   : > { %v1666_v26 = vpop.eup %1665 }
 0x427   : > { %815 = vadd.xlane.f32.xlu1 %v1658_v16  ;;  %v831_v29 = vpack.c.bf16 %v1664_v25, %v1666_v26  ;;  %v1668_v17 = vpop.eup %1667 }
 0x428   : > { %v832_v30 = vpack.c.bf16 %v1668_v17, %v1662_v24  ;;  %1398 = vmatpush3.bf16.msra.mxu0 %v1634_v42 }
 0x429   : > { %1399 = vmatprep.subr.bf16.mxu0 %v1908_v28 }
 0x42b   : > { %1384 = vmatmul.mubr.bf16.gmra.mrb[8].mxu0 %v828_v22  ;;  %811 = vadd.xlane.f32.xlu1 %v1660_v12 }
 0x42c   : > { %1387 = vmatprep.mubr.bf16.mxu0 %v829_v23  ;;  %1400 = vmatpush3.bf16.msra.mxu0 %v1635_v57 }
 0x42d   : > { %1401 = vmatprep.subr.bf16.mxu0 %v1908_v28 }
 0x42f   : > { %821 = vadd.xlane.f32.xlu1 %v1662_v24 }
 0x430   : > { %1402 = vmatpush3.bf16.msra.mxu0 %v1636_v4 }
 0x433   : > { %1388 = vmatmul.mubr.bf16.gmra.mrb[12].mxu0 %v830_v27  ;;  %817 = vadd.xlane.f32.xlu1 %v1666_v26 }
 0x434   : > { %1391 = vmatprep.mubr.bf16.mxu0 %v831_v29 }
 0x437   : > { %819 = vadd.xlane.f32.xlu1 %v1664_v25 }
 0x43b   : > { %823 = vadd.xlane.f32.xlu1 %v1668_v17  ;;  %1392 = vmatmul.mubr.bf16.gmra.mrb[16].mxu0 %v832_v30 }
 0x43c   : > { %1403 = vmatprep.mubr.msk.bf16.mxu0 %vm1914_vm2, %v1908_v28 }
 0x43f   : > { %795 = vadd.xlane.f32.xlu1 %v2316_v46 }
 0x497   : > { %v798_v32 = vpop.xlane.xlu1 %797 }
 0x498   : > { %1669 = vrcp.f32 %v798_v32 }
 0x49c   : > { %v800_v33 = vpop.xlane.xlu1 %799 }
 0x49d   : > { %1671 = vrcp.f32 %v800_v33 }
 0x4a0   : > { %v806_v34 = vpop.xlane.xlu1 %805 }
 0x4a1   : > { %1673 = vrcp.f32 %v806_v34 }
 0x4a2   : > { %v1670_v44 = vpop.eup %1669 }
 0x4a4   : > { %v802_v35 = vpop.xlane.xlu1 %801 }
 0x4a5   : > { %1675 = vrcp.f32 %v802_v35 }
 0x4a7   : > { %v1672_v47 = vpop.eup %1671 }
 0x4a8   : > { %v808_v36 = vpop.xlane.xlu1 %807  ;;  %v810_v49 = vpop.xlane.xlu0 %809 }
 0x4a9   : > { %1677 = vrcp.f32 %v808_v36 }
 0x4ab   : > { %v1674_v55 = vpop.eup %1673 }
 0x4ac   : > { %v804_v37 = vpop.xlane.xlu1 %803 }
 0x4ad   : > { %1679 = vrcp.f32 %v804_v37  ;;  %v794_v37 = vpop.xlane.xlu0 %793 }
 0x4ae   : > { %1681 = vrcp.f32 %v810_v49 }
 0x4af   : > { %v1676_v58 = vpop.eup %1675 }
 0x4b0   : > { %v814_v38 = vpop.xlane.xlu1 %813 }
 0x4b1   : > { %1683 = vrcp.f32 %v814_v38 }
 0x4b3   : > { %v1678_v60 = vpop.eup %1677 }
 0x4b4   : > { %v816_v39 = vpop.xlane.xlu1 %815 }
 0x4b5   : > { %1685 = vrcp.f32 %v816_v39 }
 0x4b7   : > { %v1680_v63 = vpop.eup %1679 }
 0x4b8   : > { %v812_v40 = vpop.xlane.xlu1 %811  ;;  %v1682_v8 = vpop.eup %1681 }
 0x4b9   : > { %1687 = vrcp.f32 %v812_v40 }
 0x4bb   : > { %v1684_v11 = vpop.eup %1683 }
 0x4bc   : > { %v822_v41 = vpop.xlane.xlu1 %821 }
 0x4bd   : > { %1689 = vrcp.f32 %v822_v41 }
 0x4bf   : > { %v1686_v14 = vpop.eup %1685 }
 0x4c0   : > { %v818_v45 = vpop.xlane.xlu1 %817 }
 0x4c1   : > { %1691 = vrcp.f32 %v818_v45 }
 0x4c3   : > { %v1688_v18 = vpop.eup %1687 }
 0x4c4   : > { %v820_v54 = vpop.xlane.xlu1 %819 }
 0x4c7   : > { %v1690_v23 = vpop.eup %1689 }
 0x4c8   : > { %v824_v6 = vpop.xlane.xlu1 %823 }
 0x4c9   : > { %1693 = vrcp.f32 %v824_v6 }
 0x4ca   : > { %1695 = vrcp.f32 %v820_v54 }
 0x4cb   : > { %v1692_v25 = vpop.eup %1691  ;;  %1697 = vrcp.f32 %v794_v37 }
 0x4cc   : > { %v796_v38 = vpop.xlane.xlu1 %795 }
 0x4cd   : > { %1699 = vrcp.f32 %v796_v38 }
 0x4d3   : > { %v1694_v27 = vpop.eup %1693 }
 0x4d4   : > { %v1696_v17 = vpop.eup %1695 }
 0x4d5   : > { %v1698_v41 = vpop.eup %1697 }
 0x4f6   : > { %v1381_v43 = vpop.f32.mrb[4].mxu0 }
 0x4f7   : > { %v2330_v46 = vpop.f32.mrb[5].mxu0  ;;  %v943_v50 = vmul.f32 %v1670_v44, %v1381_v43  ;;  %v1700_v44 = vpop.eup %1699 }
 0x4f8   : > { %v1382_v48 = vpop.f32.mrb[6].mxu0 }
 0x4f9   : > { %v945_v51 = vmul.f32 %v1672_v47, %v1382_v48  ;;  %v2332_v52 = vpop.f32.mrb[7].mxu0  ;;  %v939_v48 = vmul.f32 %v1698_v41, %v2330_v46 }
 0x4fa   : > { %v941_v49 = vmul.f32 %v1700_v44, %v2332_v52 }
 0x4fb   : > { %v1585_v53 = vpack.i.bf16 %v945_v51, %v943_v50 }
 0x4fd   : > { %1586 = vrot.lane.b32.xlu0 %v1585_v53, %s1909_s8 }
 0x4fe   : > { %v1385_v56 = vpop.f32.mrb[8].mxu0 }
 0x4ff   : > { %v891_v59 = vpop.f32.mrb[9].mxu0  ;;  %v951_v0 = vmul.f32 %v1674_v55, %v1385_v56 }
 0x500   : > { %v1386_v62 = vpop.f32.mrb[10].mxu0  ;;  %v947_v2 = vmul.f32 %v1676_v58, %v891_v59 }
 0x501   : > { %v953_v61 = vmul.f32 %v1678_v60, %v1386_v62  ;;  %v894_v1 = vpop.f32.mrb[11].mxu0 }
 0x502   : > { %v949_v3 = vmul.f32 %v1680_v63, %v894_v1 }
 0x503   : > { %v1590_v7 = vpack.i.bf16 %v953_v61, %v951_v0 }
 0x504   : > { %v1595_v5 = vpack.i.bf16 %v949_v3, %v947_v2 }
 0x505   : > { %1591 = vrot.lane.b32.xlu1 %v1590_v7, %s1910_s17  ;;  %s2353_s17 = scalar_lea.hbm %s2405_s6, %s1293_s26 }
 0x506   : > { %v1389_v10 = vpop.f32.mrb[12].mxu0 }
 0x507   : > { %v907_v13 = vpop.f32.mrb[13].mxu0  ;;  %v959_v19 = vmul.f32 %v1684_v11, %v1389_v10 }
 0x508   : > { %v1390_v15 = vpop.f32.mrb[14].mxu0  ;;  %v955_v16 = vmul.f32 %v1682_v8, %v907_v13 }
 0x509   : > { %v961_v20 = vmul.f32 %v1686_v14, %v1390_v15  ;;  %v910_v9 = vpop.f32.mrb[15].mxu0  ;;  %1596 = vrot.lane.b32.xlu1 %v1595_v5, %s1911_s18  ;;  %s1815_s18 = scalar_lea.vmem %s2347_s1, 256 }
 0x50a   : > { %v957_v12 = vmul.f32 %v1688_v18, %v910_v9  ;;  %v1281_v18 = vld [vmem:[%s2403_s4] ss:$0 sm:$0xff]  ;;  %p1816_p10 = scmp.ne.s32.totalorder %s2347_s1, %s1815_s18 }
 0x50b   : > { %v1600_v21 = vpack.i.bf16 %v961_v20, %v959_v19 }
 0x50c   : > { %v1605_v22 = vpack.i.bf16 %v957_v12, %v955_v16  ;;  %p1817_p3 = pnand %p1816_p10, %p2105_p5 }
 0x50d   : > { %1601 = vrot.lane.b32.xlu0 %v1600_v21, %s1912_s7  ;;  %s1917_s7 = smov [#allocation10]  }
 0x50e   : > { %v1393_v24 = vpop.f32.mrb[16].mxu0  ;;  %1606 = vrot.lane.b32.xlu1 %v1605_v22, %s1913_s10  ;;  %p1818_p7 = pneg %p1817_p3  ;;  %s1819_s10 = sshll.u32 %s1917_s7, 4  ;;  %s1820_s10 = int_to_ptr.vmem [resolvable:$false] %s1819_s10 }
 0x50f   : > { %v923_v26 = vpop.f32.mrb[17].mxu0  ;;  %v967_v30 = vmul.f32 %v1690_v23, %v1393_v24  ;;  %p1822_p12 = scmp.lt.s32.totalorder %s2347_s1, %s1820_s10 }
 0x510   : > { %v1394_v29 = vpop.f32.mrb[18].mxu0  ;;  %v963_v33 = vmul.f32 %v1692_v25, %v923_v26 }
 0x511   : > { %v969_v31 = vmul.f32 %v1694_v27, %v1394_v29  ;;  %v926_v32 = vpop.f32.mrb[19].mxu0 }
 0x512   : > { %v965_v34 = vmul.f32 %v1696_v17, %v926_v32 }
 0x513   : > { %v1615_v35 = vpack.i.bf16 %v969_v31, %v967_v30 }
 0x514   : > { %v1610_v36 = vpack.i.bf16 %v965_v34, %v963_v33 }
 0x515   : > { %1616 = vrot.lane.b32.xlu0 %v1615_v35, %s1915_s27  ;;  %s1821_s27 = scalar_lea.vmem %s1820_s10, 512 }
 0x516   : > { %1611 = vrot.lane.b32.xlu1 %v1610_v36, %s1916_s29  ;;  %p1823_p1 = scmp.lt.s32.totalorder %s1821_s27, %s1815_s18 }
 0x518   : > { %p1824_p2 = por %p1823_p1, %p1822_p12 }
 0x51a   : > { %p1825_p4 = pnand %p1824_p2, %p1818_p7 }
 0x56f   : > { %v1587_v39 = vpop.permute.xlu0 %1586 }
 0x570   : > { %v1589_v42 = vunpack.i.h.bf16 %v1587_v39  ;;  %v1588_v43 = vunpack.i.l.bf16 %v1587_v39 }
 0x572   : > { %v1026_v51 = vsel %vm567_vm1, %v939_v48, %v1588_v43  ;;  %v1027_v53 = vsel %vm567_vm1, %v941_v49, %v1589_v42 }
 0x577   : > { %v1592_v28 = vpop.permute.xlu1 %1591 }
 0x578   : > { %v1594_v59 = vunpack.i.h.bf16 %v1592_v28  ;;  %v1593_v60 = vunpack.i.l.bf16 %v1592_v28 }
 0x57b   : > { %v1597_v40 = vpop.permute.xlu1 %1596 }
 0x57c   : > { %v1599_v45 = vunpack.i.h.bf16 %v1597_v40  ;;  %v1598_v47 = vunpack.i.l.bf16 %v1597_v40 }
 0x57e   : > { %v1030_v54 = vsel %vm1028_vm3, %v1027_v53, %v1599_v45  ;;  %v1029_v55 = vsel %vm1028_vm3, %v1026_v51, %v1598_v47 }
 0x57f   : > { %v1602_v56 = vpop.permute.xlu0 %1601  ;;  %v1032_v62 = vsel %vm1031_vm4, %v1029_v55, %v1593_v60  ;;  %v1033_v63 = vsel %vm1031_vm4, %v1030_v54, %v1594_v59 }
 0x580   : > { %v1607_v50 = vpop.permute.xlu1 %1606  ;;  %v1604_v61 = vunpack.i.h.bf16 %v1602_v56  ;;  %v1603_v1 = vunpack.i.l.bf16 %v1602_v56 }
 0x581   : > { %v1609_v57 = vunpack.i.h.bf16 %v1607_v50  ;;  %v1608_v58 = vunpack.i.l.bf16 %v1607_v50 }
 0x583   : > { %v1035_v46 = vsel %vm1034_vm5, %v1032_v62, %v1608_v58  ;;  %v1036_v0 = vsel %vm1034_vm5, %v1033_v63, %v1609_v57 }
 0x584   : > { %v1038_v5 = vsel %vm1037_vm6, %v1035_v46, %v1603_v1  ;;  %v1039_v8 = vsel %vm1037_vm6, %v1036_v0, %v1604_v61 }
 0x587   : > { %v1617_v52 = vpop.permute.xlu0 %1616 }
 0x588   : > { %v1612_v2 = vpop.permute.xlu1 %1611  ;;  %v1619_v7 = vunpack.i.h.bf16 %v1617_v52  ;;  %v1618_v4 = vunpack.i.l.bf16 %v1617_v52 }
 0x589   : > { %v1614_v3 = vunpack.i.h.bf16 %v1612_v2  ;;  %v1613_v6 = vunpack.i.l.bf16 %v1612_v2 }
 0x58b   : > { %v1041_v10 = vsel %vm1040_vm7, %v1038_v5, %v1613_v6  ;;  %v1042_v11 = vsel %vm1040_vm7, %v1039_v8, %v1614_v3 }
 0x58c   : > { %v1044_v13 = vsel %vm1043_vm8, %v1041_v10, %v1618_v4  ;;  %v1045_v14 = vsel %vm1043_vm8, %v1042_v11, %v1619_v7 }
 0x58d   : > { %v1046_v15 = vpack.c.bf16 %v1045_v14, %v1044_v13 }
 0x58f   : > { %1404 = vmatmul.mubr.msk.bf16.vlgmr.msra.gmra.mrb[20].mxu0 %vm384_vm0, %v1046_v15 }
 0x662   : > { %v1123_v19 = vpop.f32.mrb[20].mxu0 }
 0x663   : > { %v1124_v20 = vadd.f32 %v1281_v18, %v1123_v19  ;;  %v1405_v9 = vpop.f32.mrb[21].mxu0 }
 0x664   : > { %v1126_v16 = vpop.f32.mrb[22].mxu0 }
 0x665   : > { %1130 = vst.msk [vmem:[%s313_s9] sm:$0xff] %vm384_vm0, %v1124_v20  ;;  %v1127_v12 = vadd.f32 %v1281_v18, %v1126_v16  ;;  %v1406_v21 = vpop.f32.mrb[23].mxu0 }
 0x667   : > { %1131 = vst.msk [vmem:[%s313_s9 + $0x8] sm:$0xff] %vm384_vm0, %v1127_v12 }
 0x668   : > { %1828 = shalt.err (!%p1825_p4)
}
 0x669   : > { %s1829_s29 = scalar_lea.hbm %s2353_s17, 256  ;;  %s1833_s13 = scalar_lea.hbm %s2405_s6, 512 }
 0x66a   : > { %p1830_p9 = scmp.ne.s32.totalorder %s2353_s17, %s1829_s29  ;;  %p1834_p11 = scmp.lt.u32.totalorder %s2353_s17, %s2405_s6 }
 0x66b   : > { %p1835_p13 = scmp.lt.u32.totalorder %s1833_s13, %s1829_s29  ;;  %p1837_p10 = scmp.lt.u32.totalorder %s1829_s29, %s2353_s17 }
 0x66c   : > { %p1831_p0 = pnand %p1830_p9, %p2105_p5 }
 0x66d   : > { %p1836_p6 = por %p1835_p13, %p1834_p11 }
 0x66e   : > { %p1832_p8 = pneg %p1831_p0 }
 0x66f   : > { %p1838_p3 = por %p1837_p10, %p1836_p6 }
 0x671   : > { %p1839_p7 = pnand %p1838_p3, %p1832_p8 }
 0x673   : > { %1842 = shalt.err (!%p1839_p7)
}
 0x674   : > { %s1918_s15 = smov 128  }
 0x675   : > { %1429 = dma.vmem_to_hbm [thread:$0]  (%p2105_p5), %s2347_s1, 256, %s2353_s17, %s1133_s25, %s1918_s15, %s1918_s15, %s1909_s8  }
 0x676 PF: > { %s1161_s20 = sand.u32 1, %s1877_s21   ;;  %p2429_p12 = scmp.ne.s32.totalorder %s2413_s28, 0 }
 0x677   : > { %p2430_p1 = scmp.ge.s32.totalorder %s1889_s24, 2  ;;  %s1162_s18 = scalar_lea.sflag [#allocation4], %s1161_s20 }
 0x679   : > { %p1446_p2 = pnand %p2430_p1, %p2429_p12 }
 0x67b   : > { %1872 = dma.done.wait (!%p1446_p2), %s1162_s18, 256  }
 0x67c   : > { %1874 = vsyncadd (!%p1446_p2), %s1162_s18, 4294967040  ;;  %p21_p4 = scmp.ge.s32.totalorder %s2070_s14, 4   ;;  %s2431_s21 = smov %s1881_s22 }
 0x67d   : > { %s2432_s22 = smov %s1885_s23  ;;  %s2433_s23 = smov %s2101_s11 }
 0x67e   : > { %s2434_s24 = smov %s2070_s14  ;;  %23 = sbr.rel (!%p21_p4) target bundleno = 9 (0x9), region = 101 }
 0x685   :  { %1167 = vsyncpa [#allocation3], 1 }
 0x686   :  { %1169 = vsyncpa [#allocation3 + $0x1], 1 }
 0x687   :  { %1170 = vsyncpa [#allocation6], 1 }
 0x688   :  { %1171 = vsyncpa [#allocation9], 1 }
 0x689   :  { %1172 = vsyncpa [#allocation4], 1 }
 0x68a   :  { %1174 = vsyncpa [#allocation4 + $0x1], 1 }

</bundles_post_ra>
